<compile_context>
chip_gen: v7x
topology: tpu7x:2x2x1
jax: 0.10.0
libtpu: 0.0.40
codegen_flags: <defaults>
</compile_context>

<pallas_src>
import functools
import math

import jax
import jax.numpy as jnp
import numpy as np
from jax import lax
from jax.experimental import pallas as pl
from jax.experimental.pallas import tpu as pltpu

TIME_SEQUENCE = 3
_SCORE_W = 16                 # packed score-slab lane width (>= T*T = 9)


def _round_up(x, m):
    return ((x + m - 1) // m) * m


def _attention_kernel(z_ref, wbig_ref, bbig_ref, smat_ref, gsum_ref, cbr_ref,
                      wo3_ref, bo3_ref, out_ref, *, q_width, k_width, n_scores):
    """One grid step over TB batch rows (all slabs lane-dense / 128-aligned)."""
    # ---- 1. one fused projection matmul: [QREP | KREP | V] ----------------
    proj = jnp.dot(z_ref[...], wbig_ref[...],
                   preferred_element_type=jnp.float32) + bbig_ref[...]
    q_rep = proj[:, :q_width]                     # scale*query_t, per (t,s) pair
    k_rep = proj[:, q_width:q_width + k_width]    # key_s, per (t,s) pair
    v_sec = proj[:, q_width + k_width:]           # [value_0 | value_1 | value_2 | 0]

    # ---- 2. all 9 scores: one dense multiply + one block-diag-ones matmul --
    prod = q_rep * k_rep                                           # (TB, QW)
    scores = jnp.dot(prod, smat_ref[...],
                     preferred_element_type=jnp.float32)           # (TB, 16)
    # causal-zeroed (t, s) entries are exactly 0: their smat columns are zero.

    # ---- 3. packed softmax over each t-group of 3 lanes --------------------
    m = jnp.max(scores, axis=-1, keepdims=True)    # per-row max (exact for softmax)
    e = jnp.exp(scores - m)                        # (TB, 16)
    denom = jnp.dot(e, gsum_ref[...], preferred_element_type=jnp.float32)
    lane = lax.broadcasted_iota(jnp.int32, scores.shape, 1)
    denom = denom + jnp.where(lane >= n_scores, 1.0, 0.0)   # keep pad lanes non-zero
    r = pl.reciprocal(denom, approx=True)
    r = r * (2.0 - denom * r)                      # one Newton step -> ~f32 exact
    p = e * r                                      # packed softmax probabilities

    # ---- 4. sum_t p[t] @ value  (coefficients broadcast via matmul) --------
    c_wide = jnp.dot(p, cbr_ref[...], preferred_element_type=jnp.float32)
    x_sum = c_wide * v_sec                         # (TB, VW), lane-dense

    # ---- 5. output projection, full 128-lane (unmasked) store --------------
    out = jnp.dot(x_sum.astype(wo3_ref.dtype), wo3_ref[...],
                  preferred_element_type=jnp.float32) + bo3_ref[...]
    out_ref[...] = out


def _build_tables(params, *, d_model, d_context, d_output, compute_dtype):
    """Wrapper-side weight prep: fused block-structured weights + constants."""
    T = TIME_SEQUENCE
    D = d_model
    QW = _round_up(T * T * D, 128)                 # QREP section (replicated q_t)
    KW = QW                                        # KREP section (replicated k_s)
    VW = _round_up(T * D, 128)                     # value section
    OW = _round_up(d_output, 128)                  # lane-dense output width
    PROJ_W = QW + KW + VW
    scale = 1.0 / math.sqrt(D)                     # d_k == d_model (h == 1)

    wq_t = (params["wq"] * scale).T                # 1/sqrt(d_k) folded in
    bq_s = params["bq"] * scale
    wk_t = params["wk"].T
    wv_t = params["wv"].T

    w_big = jnp.zeros((2 * T * D, PROJ_W), jnp.float32)
    b_big = jnp.zeros((1, PROJ_W), jnp.float32)
    s_mat = jnp.zeros((QW, _SCORE_W), jnp.float32)
    g_sum = jnp.zeros((_SCORE_W, _SCORE_W), jnp.float32)
    c_bro = jnp.zeros((_SCORE_W, VW), jnp.float32)

    for t in range(T):
        for s in range(T):
            pidx = T * t + s
            # scaled query_t, replicated once per (t, s) pair (input = q half)
            w_big = w_big.at[t * D:(t + 1) * D,
                             pidx * D:(pidx + 1) * D].set(wq_t)
            b_big = b_big.at[0, pidx * D:(pidx + 1) * D].set(bq_s)
            # key_s, replicated once per (t, s) pair (input = k half)
            w_big = w_big.at[(T + s) * D:(T + s + 1) * D,
                             QW + pidx * D:QW + (pidx + 1) * D].set(wk_t)
            b_big = b_big.at[0, QW + pidx * D:QW + (pidx + 1) * D].set(params["bk"])
            # score-reduction column; zero column where the reference zeroes scores
            zeroed = (s < t) and (s < d_context) and (t < d_context)
            if not zeroed:
                s_mat = s_mat.at[pidx * D:(pidx + 1) * D, pidx].set(1.0)
            # softmax group-sum (denominator replicated to all 9 lanes)
            for s2 in range(T):
                g_sum = g_sum.at[T * t + s2, pidx].set(1.0)
            # sum over t of p[t, s], broadcast across the D lanes of value_s
            c_bro = c_bro.at[pidx, s * D:(s + 1) * D].set(1.0)

    for t in range(T):
        # value_t (input = q half, same as query input)
        w_big = w_big.at[t * D:(t + 1) * D,
                         QW + KW + t * D:QW + KW + (t + 1) * D].set(wv_t)
        b_big = b_big.at[0, QW + KW + t * D:QW + KW + (t + 1) * D].set(params["bv"])

    # out_linear applied to the (un-summed) 3x replicated value slab; the sum
    # over sequence positions is absorbed by stacking Wo^T three times.
    wo3 = jnp.zeros((VW, OW), jnp.float32)
    for s in range(T):
        wo3 = wo3.at[s * D:(s + 1) * D, :d_output].set(params["wo"].T)
    bo3 = jnp.zeros((1, OW), jnp.float32).at[0, :d_output].set(T * params["bo"])

    w_big = w_big.astype(compute_dtype)
    wo3 = wo3.astype(compute_dtype)
    return (w_big, b_big, s_mat, g_sum, c_bro, wo3, bo3), (QW, KW, VW, OW, PROJ_W)


def init_params(key, d_model, d_output):
    """Deterministic parameter init, PyTorch-Linear-style shapes (out, in)."""
    ks = jax.random.split(key, 8)
    bound = 1.0 / math.sqrt(d_model)

    def u(k, shape):
        return jax.random.uniform(k, shape, jnp.float32, -bound, bound)

    return {
        "wq": u(ks[0], (d_model, d_model)), "bq": u(ks[1], (d_model,)),
        "wk": u(ks[2], (d_model, d_model)), "bk": u(ks[3], (d_model,)),
        "wv": u(ks[4], (d_model, d_model)), "bv": u(ks[5], (d_model,)),
        "wo": u(ks[6], (d_output, d_model)), "bo": u(ks[7], (d_output,)),
    }


def attention_forward(z, params, *, h, d_model, d_context, d_output,
                      batch_tile=1024, compute_dtype=jnp.float32):
    """Pallas forward. compute_dtype=jnp.bfloat16 enables fast MXU operands on
    v6e/v7x (softmax + accumulation stay f32); f32 gives exact reference parity."""
    T = TIME_SEQUENCE
    d_k = d_model // h
    assert d_k == d_model, "PyTorch forward only type-checks when h == 1 (d_k == d_model)"
    assert d_context <= T

    if z.ndim == 1:
        z = z.reshape(1, -1)
    B = z.shape[0]
    assert z.shape[1] == 2 * T * d_model

    tables, (QW, KW, VW, OW, PROJ_W) = _build_tables(
        params, d_model=d_model, d_context=d_context, d_output=d_output,
        compute_dtype=compute_dtype)
    w_big, b_big, s_mat, g_sum, c_bro, wo3, bo3 = tables

    z = z.astype(compute_dtype)

    # Batch tiling: amortize per-grid-step pipeline overhead. Sublane
    # granularity: 8 rows for 4-byte operands, 16 for 2-byte (bf16).
    sub = 8 if jnp.dtype(compute_dtype).itemsize >= 4 else 16
    TB = min(int(batch_tile), _round_up(B, sub))
    TB = max(sub, (TB // sub) * sub)
    B_pad = _round_up(B, TB)
    # Prefer >= 2 grid steps so the "parallel" axis can shard across both
    # TensorCores on v7x (negligible cost on single-TC v5e/v6e).
    if B_pad // TB == 1 and TB % (2 * sub) == 0:
        TB //= 2
        B_pad = _round_up(B, TB)
    if B_pad != B:
        z = jnp.pad(z, ((0, B_pad - B), (0, 0)))

    kernel = functools.partial(_attention_kernel, q_width=QW, k_width=KW,
                               n_scores=T * T)
    full = lambda b: (0, 0)   # weights / constants: same (full) block every step

    # Advisory cost estimate for the XLA scheduler.
    itemsize = jnp.dtype(compute_dtype).itemsize
    flops = B_pad * 2 * (2 * T * d_model * PROJ_W + QW * _SCORE_W
                         + _SCORE_W * _SCORE_W + _SCORE_W * VW + VW * OW)
    bytes_accessed = (B_pad * 2 * T * d_model * itemsize + B_pad * OW * 4
                      + (w_big.size + wo3.size) * itemsize
                      + (b_big.size + s_mat.size + g_sum.size + c_bro.size
                         + bo3.size) * 4)

    out = pl.pallas_call(
        kernel,
        out_shape=jax.ShapeDtypeStruct((B_pad, OW), jnp.float32),
        grid_spec=pltpu.PrefetchScalarGridSpec(
            num_scalar_prefetch=0,
            grid=(B_pad // TB,),
            in_specs=[
                pl.BlockSpec((TB, 2 * T * d_model), lambda b: (b, 0)),   # z rows
                pl.BlockSpec((2 * T * d_model, PROJ_W), full),           # fused W
                pl.BlockSpec((1, PROJ_W), full),                         # fused b
                pl.BlockSpec((QW, _SCORE_W), full),                      # score ones
                pl.BlockSpec((_SCORE_W, _SCORE_W), full),                # group sum
                pl.BlockSpec((_SCORE_W, VW), full),                      # c broadcast
                pl.BlockSpec((VW, OW), full),                            # Wo (x3)
                pl.BlockSpec((1, OW), full),                             # T * bo
            ],
            out_specs=pl.BlockSpec((TB, OW), lambda b: (b, 0)),
        ),
        compiler_params=pltpu.CompilerParams(
            dimension_semantics=("parallel",),
            vmem_limit_bytes=48 * 1024 * 1024),
        cost_estimate=pl.CostEstimate(
            flops=int(flops),
            transcendentals=int(B_pad * _SCORE_W),
            bytes_accessed=int(bytes_accessed)),
    )(z, w_big, b_big, s_mat, g_sum, c_bro, wo3, bo3)

    # TODO(synk): a further 4-rows-per-sublane fold (review item 5) would shrink
    # the remaining (TB, 16) softmax slab ops 4x at the cost of a 4x wider
    # block-diagonal projection; not applied since the MXU would then dominate.
    return out[:B, :d_output]


def attention_reference(z, params, *, h, d_model, d_context, d_output):
    """Pure-JAX reference mirroring the PyTorch forward."""
    d_k = d_model // h
    if z.ndim == 1:
        z = z.reshape(1, -1)
    B = z.shape[0]
    zz = z.reshape(B, 2, TIME_SEQUENCE, d_k)
    q, k, v = zz[:, 0], zz[:, 1], zz[:, 0]
    query = q @ params["wq"].T + params["bq"]
    key = k @ params["wk"].T + params["bk"]
    value = v @ params["wv"].T + params["bv"]
    scores = jnp.einsum("btd,bsd->bts", query, key) / math.sqrt(d_k)
    T = TIME_SEQUENCE
    rows = jnp.arange(T)[:, None]
    cols = jnp.arange(T)[None, :]
    zero_mask = (cols < rows) & (rows < d_context) & (cols < d_context)
    scores = jnp.where(zero_mask[None], 0.0, scores)
    p = jax.nn.softmax(scores, axis=-1)
    x = jnp.einsum("bts,bsd->btd", p, value)
    x = x @ params["wo"].T + params["bo"]
    return jnp.sum(x, axis=1)


if __name__ == "__main__":
    # h must be 1 for the PyTorch forward to type-check; d_context <= 3.
    h, d_model, d_context, d_output = 1, 32, TIME_SEQUENCE, 16

    key = jax.random.PRNGKey(0)
    pkey, zkey1, zkey2 = jax.random.split(key, 3)
    params = init_params(pkey, d_model, d_output)

    # --- f32 exact-parity check: batch=2 (single grid step) ---
    batch = 2
    z = jax.random.normal(zkey1, (batch, 2 * TIME_SEQUENCE * d_model), jnp.float32)
    out = attention_forward(z, params, h=h, d_model=d_model,
                            d_context=d_context, d_output=d_output)
    out = jax.block_until_ready(out)
    ref = attention_reference(z, params, h=h, d_model=d_model,
                              d_context=d_context, d_output=d_output)
    np.testing.assert_allclose(np.asarray(out), np.asarray(ref),
                               rtol=1e-4, atol=1e-4)
    assert out.shape == (batch, d_output)

    # --- f32 multi-step check: batch=20, tile=8 -> padding + 3 grid steps ---
    batch2 = 20
    z2 = jax.random.normal(zkey2, (batch2, 2 * TIME_SEQUENCE * d_model), jnp.float32)
    out2 = attention_forward(z2, params, h=h, d_model=d_model,
                             d_context=d_context, d_output=d_output,
                             batch_tile=8)
    out2 = jax.block_until_ready(out2)
    ref2 = attention_reference(z2, params, h=h, d_model=d_model,
                               d_context=d_context, d_output=d_output)
    np.testing.assert_allclose(np.asarray(out2), np.asarray(ref2),
                               rtol=1e-4, atol=1e-4)
    assert out2.shape == (batch2, d_output)

    # --- bf16-operand path (v6e/v7x MXU feedback); softmax stays f32 ---
    out3 = attention_forward(z2, params, h=h, d_model=d_model,
                             d_context=d_context, d_output=d_output,
                             compute_dtype=jnp.bfloat16)
    out3 = jax.block_until_ready(out3)
    np.testing.assert_allclose(np.asarray(out3), np.asarray(ref2),
                               rtol=4e-2, atol=4e-2)
    assert out3.shape == (batch2, d_output)

    print("KERNEL_OK")
</pallas_src>

<mosaic_0001>
module attributes {stable_mosaic.version = 11 : i64} {
  func.func @_attention_kernel(%arg0: i32, %arg1: memref<8x192xf32, #tpu.memory_space<vmem>>, %arg2: memref<192x896xf32, #tpu.memory_space<vmem>>, %arg3: memref<1x896xf32, #tpu.memory_space<vmem>>, %arg4: memref<384x16xf32, #tpu.memory_space<vmem>>, %arg5: memref<16x16xf32, #tpu.memory_space<vmem>>, %arg6: memref<16x128xf32, #tpu.memory_space<vmem>>, %arg7: memref<128x128xf32, #tpu.memory_space<vmem>>, %arg8: memref<1x128xf32, #tpu.memory_space<vmem>>, %arg9: memref<8x128xf32, #tpu.memory_space<vmem>>) attributes {dimension_semantics = [#tpu.dimension_semantics<parallel>], iteration_bounds = array<i64: 1>, scalar_prefetch = 0 : i64, scratch_operands = 0 : i64, tpu.core_type = #tpu.core_type<tc>, window_params = [{transform_indices = @transform_0, window_bounds = array<i64: 8, 192>}, {pipeline_mode = #tpu.pipeline_mode<synchronous>, transform_indices = @transform_1, window_bounds = array<i64: 192, 896>}, {pipeline_mode = #tpu.pipeline_mode<synchronous>, transform_indices = @transform_2, window_bounds = array<i64: 1, 896>}, {pipeline_mode = #tpu.pipeline_mode<synchronous>, transform_indices = @transform_3, window_bounds = array<i64: 384, 16>}, {pipeline_mode = #tpu.pipeline_mode<synchronous>, transform_indices = @transform_4, window_bounds = array<i64: 16, 16>}, {pipeline_mode = #tpu.pipeline_mode<synchronous>, transform_indices = @transform_5, window_bounds = array<i64: 16, 128>}, {pipeline_mode = #tpu.pipeline_mode<synchronous>, transform_indices = @transform_6, window_bounds = array<i64: 128, 128>}, {pipeline_mode = #tpu.pipeline_mode<synchronous>, transform_indices = @transform_7, window_bounds = array<i64: 1, 128>}, {transform_indices = @transform_8, window_bounds = array<i64: 8, 128>}]} {
    %c0 = arith.constant 0 : index
    %c0_0 = arith.constant 0 : index
    %0 = vector.load %arg1[%c0, %c0_0] : memref<8x192xf32, #tpu.memory_space<vmem>>, vector<8x192xf32>
    %c0_1 = arith.constant 0 : index
    %c0_2 = arith.constant 0 : index
    %1 = vector.load %arg2[%c0_1, %c0_2] : memref<192x896xf32, #tpu.memory_space<vmem>>, vector<192x896xf32>
    %cst = arith.constant dense<0.000000e+00> : vector<8x896xf32>
    %2 = tpu.matmul %0, %1, %cst {dimension_numbers = #tpu.dot_dimension_numbers<[1], [0], [0], [1], [0, 0, 1, 1], [], []>} : vector<8x192xf32>, vector<192x896xf32>, vector<8x896xf32> -> vector<8x896xf32>
    %c0_3 = arith.constant 0 : index
    %c0_4 = arith.constant 0 : index
    %3 = vector.load %arg3[%c0_3, %c0_4] : memref<1x896xf32, #tpu.memory_space<vmem>>, vector<1x896xf32>
    %4 = vector.broadcast %3 : vector<1x896xf32> to vector<8x896xf32>
    %5 = arith.addf %2, %4 : vector<8x896xf32>
    %6 = vector.extract_strided_slice %5 {offsets = [0, 0], sizes = [8, 384], strides = [1, 1]} : vector<8x896xf32> to vector<8x384xf32>
    %7 = vector.extract_strided_slice %5 {offsets = [0, 384], sizes = [8, 384], strides = [1, 1]} : vector<8x896xf32> to vector<8x384xf32>
    %8 = vector.extract_strided_slice %5 {offsets = [0, 768], sizes = [8, 128], strides = [1, 1]} : vector<8x896xf32> to vector<8x128xf32>
    %9 = arith.mulf %6, %7 : vector<8x384xf32>
    %c0_5 = arith.constant 0 : index
    %c0_6 = arith.constant 0 : index
    %10 = vector.load %arg4[%c0_5, %c0_6] : memref<384x16xf32, #tpu.memory_space<vmem>>, vector<384x16xf32>
    %cst_7 = arith.constant dense<0.000000e+00> : vector<8x16xf32>
    %11 = tpu.matmul %9, %10, %cst_7 {dimension_numbers = #tpu.dot_dimension_numbers<[1], [0], [0], [1], [0, 0, 1, 1], [], []>} : vector<8x384xf32>, vector<384x16xf32>, vector<8x16xf32> -> vector<8x16xf32>
    %cst_8 = arith.constant dense<0xFF800000> : vector<8xf32>
    %12 = vector.multi_reduction <maximumf>, %11, %cst_8 [1] : vector<8x16xf32> to vector<8xf32>
    %13 = vector.shape_cast %12 : vector<8xf32> to vector<8x1xf32>
    %14 = vector.broadcast %13 : vector<8x1xf32> to vector<8x16xf32>
    %15 = arith.subf %11, %14 : vector<8x16xf32>
    %16 = math.exp %15 : vector<8x16xf32>
    %c0_9 = arith.constant 0 : index
    %c0_10 = arith.constant 0 : index
    %17 = vector.load %arg5[%c0_9, %c0_10] : memref<16x16xf32, #tpu.memory_space<vmem>>, vector<16x16xf32>
    %cst_11 = arith.constant dense<0.000000e+00> : vector<8x16xf32>
    %18 = tpu.matmul %16, %17, %cst_11 {dimension_numbers = #tpu.dot_dimension_numbers<[1], [0], [0], [1], [0, 0, 1, 1], [], []>} : vector<8x16xf32>, vector<16x16xf32>, vector<8x16xf32> -> vector<8x16xf32>
    %19 = tpu.iota {dimensions = array<i32: 1>} : vector<8x16xi32>
    %c9_i32 = arith.constant 9 : i32
    %20 = vector.broadcast %c9_i32 : i32 to vector<8x16xi32>
    %21 = arith.cmpi sge, %19, %20 : vector<8x16xi32>
    %cst_12 = arith.constant 1.000000e+00 : f32
    %cst_13 = arith.constant 0.000000e+00 : f32
    %22 = vector.broadcast %cst_12 : f32 to vector<8x16xf32>
    %23 = vector.broadcast %cst_13 : f32 to vector<8x16xf32>
    %24 = arith.select %21, %22, %23 : vector<8x16xi1>, vector<8x16xf32>
    %25 = arith.addf %18, %24 : vector<8x16xf32>
    %26 = tpu.reciprocal %25 {approx = true} : vector<8x16xf32> -> vector<8x16xf32>
    %27 = arith.mulf %25, %26 : vector<8x16xf32>
    %cst_14 = arith.constant 2.000000e+00 : f32
    %28 = vector.broadcast %cst_14 : f32 to vector<8x16xf32>
    %29 = arith.subf %28, %27 : vector<8x16xf32>
    %30 = arith.mulf %26, %29 : vector<8x16xf32>
    %31 = arith.mulf %16, %30 : vector<8x16xf32>
    %c0_15 = arith.constant 0 : index
    %c0_16 = arith.constant 0 : index
    %32 = vector.load %arg6[%c0_15, %c0_16] : memref<16x128xf32, #tpu.memory_space<vmem>>, vector<16x128xf32>
    %cst_17 = arith.constant dense<0.000000e+00> : vector<8x128xf32>
    %33 = tpu.matmul %31, %32, %cst_17 {dimension_numbers = #tpu.dot_dimension_numbers<[1], [0], [0], [1], [0, 0, 1, 1], [], []>} : vector<8x16xf32>, vector<16x128xf32>, vector<8x128xf32> -> vector<8x128xf32>
    %34 = arith.mulf %33, %8 : vector<8x128xf32>
    %c0_18 = arith.constant 0 : index
    %c0_19 = arith.constant 0 : index
    %35 = vector.load %arg7[%c0_18, %c0_19] : memref<128x128xf32, #tpu.memory_space<vmem>>, vector<128x128xf32>
    %cst_20 = arith.constant dense<0.000000e+00> : vector<8x128xf32>
    %36 = tpu.matmul %34, %35, %cst_20 {dimension_numbers = #tpu.dot_dimension_numbers<[1], [0], [0], [1], [0, 0, 1, 1], [], []>} : vector<8x128xf32>, vector<128x128xf32>, vector<8x128xf32> -> vector<8x128xf32>
    %c0_21 = arith.constant 0 : index
    %c0_22 = arith.constant 0 : index
    %37 = vector.load %arg8[%c0_21, %c0_22] : memref<1x128xf32, #tpu.memory_space<vmem>>, vector<1x128xf32>
    %38 = vector.broadcast %37 : vector<1x128xf32> to vector<8x128xf32>
    %39 = arith.addf %36, %38 : vector<8x128xf32>
    %c0_23 = arith.constant 0 : index
    %c0_24 = arith.constant 0 : index
    %40 = vector.load %arg9[%c0_23, %c0_24] : memref<8x128xf32, #tpu.memory_space<vmem>>, vector<8x128xf32>
    tpu.vector_store %arg9[%c0_23, %c0_24], %39 {strides = array<i32>} : memref<8x128xf32, #tpu.memory_space<vmem>>, vector<8x128xf32>,
    return
  }
  func.func @transform_0(%arg0: i32) -> (i32, i32) {
    %c0_i32 = arith.constant 0 : i32
    %c0_i32_0 = arith.constant 0 : i32
    return %arg0, %c0_i32 : i32, i32
  }
  func.func @transform_1(%arg0: i32) -> (i32, i32) {
    %c0_i32 = arith.constant 0 : i32
    %c0_i32_0 = arith.constant 0 : i32
    %c0_i32_1 = arith.constant 0 : i32
    return %c0_i32, %c0_i32_0 : i32, i32
  }
  func.func @transform_2(%arg0: i32) -> (i32, i32) {
    %c0_i32 = arith.constant 0 : i32
    %c0_i32_0 = arith.constant 0 : i32
    %c0_i32_1 = arith.constant 0 : i32
    return %c0_i32, %c0_i32_0 : i32, i32
  }
  func.func @transform_3(%arg0: i32) -> (i32, i32) {
    %c0_i32 = arith.constant 0 : i32
    %c0_i32_0 = arith.constant 0 : i32
    %c0_i32_1 = arith.constant 0 : i32
    return %c0_i32, %c0_i32_0 : i32, i32
  }
  func.func @transform_4(%arg0: i32) -> (i32, i32) {
    %c0_i32 = arith.constant 0 : i32
    %c0_i32_0 = arith.constant 0 : i32
    %c0_i32_1 = arith.constant 0 : i32
    return %c0_i32, %c0_i32_0 : i32, i32
  }
  func.func @transform_5(%arg0: i32) -> (i32, i32) {
    %c0_i32 = arith.constant 0 : i32
    %c0_i32_0 = arith.constant 0 : i32
    %c0_i32_1 = arith.constant 0 : i32
    return %c0_i32, %c0_i32_0 : i32, i32
  }
  func.func @transform_6(%arg0: i32) -> (i32, i32) {
    %c0_i32 = arith.constant 0 : i32
    %c0_i32_0 = arith.constant 0 : i32
    %c0_i32_1 = arith.constant 0 : i32
    return %c0_i32, %c0_i32_0 : i32, i32
  }
  func.func @transform_7(%arg0: i32) -> (i32, i32) {
    %c0_i32 = arith.constant 0 : i32
    %c0_i32_0 = arith.constant 0 : i32
    %c0_i32_1 = arith.constant 0 : i32
    return %c0_i32, %c0_i32_0 : i32, i32
  }
  func.func @transform_8(%arg0: i32) -> (i32, i32) {
    %c0_i32 = arith.constant 0 : i32
    %c0_i32_0 = arith.constant 0 : i32
    return %arg0, %c0_i32 : i32, i32
  }
}

</mosaic_0001>

<bundles_post_ra>
// kernel: tpu_custom_call.1
= control target key start
LH: loop header
LB: loop body
LE: loop exit
PB: predicated region body
PF: predicated region fallthrough
CT: control target
= control target key end

     0   :  { %13 = vsyncpa [#allocation3], 0  ;;  %s1869_s0 = inlined_call_operand.vmem [shape: f32[8,192], index: 0, kind: input, shape index: {}]   ;;  %s1870_s1 = inlined_call_operand.hbm [shape: f32[192,896], index: 1, kind: input, shape index: {}]   ;;  %s1871_s2 = inlined_call_operand.vmem [shape: f32[1,896], index: 2, kind: input, shape index: {}]   ;;  %s1872_s3 = inlined_call_operand.vmem [shape: f32[384,16], index: 3, kind: input, shape index: {}]   ;;  %s1873_s4 = inlined_call_operand.vmem [shape: f32[16,16], index: 4, kind: input, shape index: {}]   ;;  %s1874_s5 = inlined_call_operand.vmem [shape: f32[16,128], index: 5, kind: input, shape index: {}]   ;;  %s1875_s6 = inlined_call_operand.vmem [shape: f32[128,128], index: 6, kind: input, shape index: {}]   ;;  %s1876_s7 = inlined_call_operand.vmem [shape: f32[1,128], index: 7, kind: input, shape index: {}]   ;;  %s1877_s8 = inlined_call_operand.hbm [shape: f32[8,128], index: 8, kind: output, shape index: {}]  }
   0x1   :  { %14 = vsyncpa [#allocation4], 0  ;;  %s1496_s27 = smov [#allocation2]   ;;  %s1448_s9 = scalar_lea.hbm %s1870_s1, 21504 }
   0x2   :  { %s22_s28 = sshll.u32 %s1496_s27, 4  ;;  %p1449_p0 = scmp.ne.s32.totalorder %s1870_s1, %s1448_s9  ;;  %s23_s28 = int_to_ptr.vmem [resolvable:$true] %s22_s28 }
   0x3   :  { %p1452_p1 = scmp.lt.u32.totalorder %s1448_s9, %s1870_s1 }
   0x5   :  { %p1454_p2 = pnand %p1452_p1, %p1449_p0 }
   0x7   :  { %1457 = shalt.err (!%p1454_p2)
}
   0x8   :  { %s1458_s14 = scalar_lea.vmem %s23_s28, 21504  ;;  %p1463_p4 = scmp.lt.s32.totalorder %s23_s28, %s23_s28 }
   0x9   :  { %p1459_p3 = scmp.ne.s32.totalorder %s23_s28, %s1458_s14  ;;  %p1464_p5 = scmp.lt.s32.totalorder %s1458_s14, %s1458_s14 }
   0xb   :  { %p1465_p6 = por %p1464_p5, %p1463_p4 }
   0xd   :  { %p1466_p7 = pnand %p1465_p6, %p1459_p3 }
   0xf   :  { %1469 = shalt.err (!%p1466_p7)
}
  0x10   :  { %s1497_s15 = smov 896   ;;  %s1498_s16 = smov 56  }
  0x11   :  { %28 = dma.hbm_to_vmem [thread:$0]  %s1870_s1, 21504, %s23_s28, [#allocation3], %s1497_s15, %s1497_s15, %s1498_s16  }
  0x12   :  { %1492 = dma.done.wait [#allocation3], 21504  }
  0x13   :  { %1493 = vsyncadd [#allocation3], 4294945792  ;;  %v47_v0 = vld [vmem:[#allocation2 + $0x8] sm:$0xff]  ;;  %v54_v1 = vld [vmem:[#allocation2 + $0x40] sm:$0xff]  ;;  %vm251_vm0 = vcmask 523264   ;;  %vm1500_vm1 = vmmov 0  }
  0x14   :  { %v49_v2 = vld [vmem:[#allocation2 + $0x18] sm:$0xff]  ;;  %v1171_v3 = vpack.c.bf16 %v54_v1, %v47_v0  ;;  %v56_v4 = vld [vmem:[#allocation2 + $0x50] sm:$0xff]  ;;  %v46_v5 = vld [vmem:[#allocation2] sm:$0xff]  ;;  %vm729_vm2 = vcmask 130048   ;;  %s1502_s12 = smov [#allocation5]  }
  0x15   :  { %v53_v6 = vld [vmem:[#allocation2 + $0x38] sm:$0xff]  ;;  %v1219_v7 = vpack.c.bf16 %v56_v4, %v49_v2  ;;  %v48_v9 = vld [vmem:[#allocation2 + $0x10] sm:$0xff]  ;;  %v55_v10 = vld [vmem:[#allocation2 + $0x48] sm:$0xff]  ;;  %s996_s13 = sshll.u32 %s1502_s12, 4  ;;  %s997_s13 = int_to_ptr.vmem [resolvable:$true] %s996_s13 }
  0x16   :  { %v1173_v8 = vpack.c.bf16 %v53_v6, %v46_v5  ;;  %v61_v11 = vld [vmem:[#allocation2 + $0x78] sm:$0xff]  ;;  %1172 = vmatprep.subr.bf16.mxu0 %v1171_v3  ;;  %v1221_v12 = vpack.c.bf16 %v55_v10, %v48_v9  ;;  %v68_v13 = vld [vmem:[#allocation2 + $0xb0] sm:$0xff]  ;;  %v63_v14 = vld [vmem:[#allocation2 + $0x88] sm:$0xff]  ;;  %p1475_p9 = scmp.lt.s32.totalorder %s997_s13, %s997_s13 }
  0x17   :  { %v70_v15 = vld [vmem:[#allocation2 + $0xc0] sm:$0xff]  ;;  %1220 = vmatprep.subr.bf16.mxu1 %v1219_v7  ;;  %v1175_v16 = vpack.c.bf16 %v68_v13, %v61_v11  ;;  %v60_v18 = vld [vmem:[#allocation2 + $0x70] sm:$0xff]  ;;  %v67_v19 = vld [vmem:[#allocation2 + $0xa8] sm:$0xff] }
  0x18   :  { %1174 = vmatpush1.bf16.msra.mxu0 %v1173_v8  ;;  %v1223_v17 = vpack.c.bf16 %v70_v15, %v63_v14  ;;  %v62_v20 = vld [vmem:[#allocation2 + $0x80] sm:$0xff]  ;;  %1222 = vmatpush1.bf16.msra.mxu1 %v1221_v12  ;;  %v1177_v21 = vpack.c.bf16 %v67_v19, %v60_v18  ;;  %v69_v22 = vld [vmem:[#allocation2 + $0xb8] sm:$0xff]  ;;  %v75_v23 = vld [vmem:[#allocation2 + $0xe8] sm:$0xff] }
  0x19   :  { %v82_v24 = vld [vmem:[#allocation2 + $0x120] sm:$0xff]  ;;  %1176 = vmatprep.subr.bf16.mxu0 %v1175_v16  ;;  %v1225_v25 = vpack.c.bf16 %v69_v22, %v62_v20  ;;  %v77_v27 = vld [vmem:[#allocation2 + $0xf8] sm:$0xff]  ;;  %v84_v28 = vld [vmem:[#allocation2 + $0x130] sm:$0xff] }
  0x1a   :  { %1224 = vmatprep.subr.bf16.mxu1 %v1223_v17  ;;  %v1179_v26 = vpack.c.bf16 %v82_v24, %v75_v23  ;;  %v74_v29 = vld [vmem:[#allocation2 + $0xe0] sm:$0xff]  ;;  %v1227_v30 = vpack.c.bf16 %v84_v28, %v77_v27  ;;  %v81_v31 = vld [vmem:[#allocation2 + $0x118] sm:$0xff]  ;;  %v76_v32 = vld [vmem:[#allocation2 + $0xf0] sm:$0xff] }
  0x1b   :  { %v83_v33 = vld [vmem:[#allocation2 + $0x128] sm:$0xff]  ;;  %v1181_v34 = vpack.c.bf16 %v81_v31, %v74_v29  ;;  %v89_v35 = vld [vmem:[#allocation2 + $0x158] sm:$0xff]  ;;  %v96_v36 = vld [vmem:[#allocation2 + $0x190] sm:$0xff] }
  0x1c   :  { %1178 = vmatpush1.bf16.msra.mxu0 %v1177_v21  ;;  %v91_v37 = vld [vmem:[#allocation2 + $0x168] sm:$0xff]  ;;  %1226 = vmatpush1.bf16.msra.mxu1 %v1225_v25  ;;  %v1229_v38 = vpack.c.bf16 %v83_v33, %v76_v32  ;;  %v1183_v39 = vpack.c.bf16 %v96_v36, %v89_v35  ;;  %v98_v40 = vld [vmem:[#allocation2 + $0x1a0] sm:$0xff]  ;;  %v88_v41 = vld [vmem:[#allocation2 + $0x150] sm:$0xff] }
  0x1d   :  { %1180 = vmatprep.subr.bf16.mxu0 %v1179_v26  ;;  %v95_v42 = vld [vmem:[#allocation2 + $0x188] sm:$0xff]  ;;  %1228 = vmatprep.subr.bf16.mxu1 %v1227_v30  ;;  %v1231_v43 = vpack.c.bf16 %v98_v40, %v91_v37  ;;  %v90_v44 = vld [vmem:[#allocation2 + $0x160] sm:$0xff]  ;;  %v97_v45 = vld [vmem:[#allocation2 + $0x198] sm:$0xff] }
  0x1e   :  { %v103_v46 = vld [vmem:[#allocation2 + $0x1c8] sm:$0xff]  ;;  %v110_v47 = vld [vmem:[#allocation2 + $0x200] sm:$0xff]  ;;  %v105_v48 = vld [vmem:[#allocation2 + $0x1d8] sm:$0xff]  ;;  %v1185_v50 = vpack.c.bf16 %v95_v42, %v88_v41  ;;  %v1233_v51 = vpack.c.bf16 %v97_v45, %v90_v44 }
  0x1f   :  { %v112_v49 = vld [vmem:[#allocation2 + $0x210] sm:$0xff]  ;;  %v1187_v52 = vpack.c.bf16 %v110_v47, %v103_v46  ;;  %v102_v53 = vld [vmem:[#allocation2 + $0x1c0] sm:$0xff]  ;;  %v109_v54 = vld [vmem:[#allocation2 + $0x1f8] sm:$0xff] }
  0x20   :  { %1182 = vmatpush1.bf16.msra.mxu0 %v1181_v34  ;;  %1230 = vmatpush1.bf16.msra.mxu1 %v1229_v38  ;;  %v104_v55 = vld [vmem:[#allocation2 + $0x1d0] sm:$0xff]  ;;  %v1235_v56 = vpack.c.bf16 %v112_v49, %v105_v48  ;;  %v111_v57 = vld [vmem:[#allocation2 + $0x208] sm:$0xff]  ;;  %v117_v58 = vld [vmem:[#allocation2 + $0x238] sm:$0xff]  ;;  %v1189_v62 = vpack.c.bf16 %v109_v54, %v102_v53 }
  0x21   :  { %1184 = vmatprep.subr.bf16.mxu0 %v1183_v39  ;;  %1232 = vmatprep.subr.bf16.mxu1 %v1231_v43  ;;  %v124_v59 = vld [vmem:[#allocation2 + $0x270] sm:$0xff]  ;;  %v119_v60 = vld [vmem:[#allocation2 + $0x248] sm:$0xff]  ;;  %v126_v61 = vld [vmem:[#allocation2 + $0x280] sm:$0xff]  ;;  %v1237_v63 = vpack.c.bf16 %v111_v57, %v104_v55 }
  0x22   :  { %v1191_v0 = vpack.c.bf16 %v124_v59, %v117_v58  ;;  %v116_v1 = vld [vmem:[#allocation2 + $0x230] sm:$0xff]  ;;  %v123_v2 = vld [vmem:[#allocation2 + $0x268] sm:$0xff]  ;;  %v118_v3 = vld [vmem:[#allocation2 + $0x240] sm:$0xff]  ;;  %v1239_v4 = vpack.c.bf16 %v126_v61, %v119_v60 }
  0x23   :  { %v125_v5 = vld [vmem:[#allocation2 + $0x278] sm:$0xff]  ;;  %v131_v6 = vld [vmem:[#allocation2 + $0x2a8] sm:$0xff]  ;;  %v138_v7 = vld [vmem:[#allocation2 + $0x2e0] sm:$0xff]  ;;  %v1193_v10 = vpack.c.bf16 %v123_v2, %v116_v1 }
  0x24   :  { %1186 = vmatpush1.bf16.msra.mxu0 %v1185_v50  ;;  %1234 = vmatpush1.bf16.msra.mxu1 %v1233_v51  ;;  %v133_v8 = vld [vmem:[#allocation2 + $0x2b8] sm:$0xff]  ;;  %v140_v9 = vld [vmem:[#allocation2 + $0x2f0] sm:$0xff]  ;;  %v1241_v11 = vpack.c.bf16 %v125_v5, %v118_v3  ;;  %v1195_v12 = vpack.c.bf16 %v138_v7, %v131_v6  ;;  %v130_v13 = vld [vmem:[#allocation2 + $0x2a0] sm:$0xff] }
  0x25   :  { %1188 = vmatprep.subr.bf16.mxu0 %v1187_v52  ;;  %1236 = vmatprep.subr.bf16.mxu1 %v1235_v56  ;;  %v137_v14 = vld [vmem:[#allocation2 + $0x2d8] sm:$0xff]  ;;  %v132_v15 = vld [vmem:[#allocation2 + $0x2b0] sm:$0xff]  ;;  %v1243_v16 = vpack.c.bf16 %v140_v9, %v133_v8  ;;  %v139_v17 = vld [vmem:[#allocation2 + $0x2e8] sm:$0xff] }
  0x26   :  { %v145_v18 = vld [vmem:[#allocation2 + $0x318] sm:$0xff]  ;;  %v152_v19 = vld [vmem:[#allocation2 + $0x350] sm:$0xff]  ;;  %v147_v20 = vld [vmem:[#allocation2 + $0x328] sm:$0xff]  ;;  %v1197_v22 = vpack.c.bf16 %v137_v14, %v130_v13  ;;  %v1245_v23 = vpack.c.bf16 %v139_v17, %v132_v15 }
  0x27   :  { %v154_v21 = vld [vmem:[#allocation2 + $0x360] sm:$0xff]  ;;  %v1199_v24 = vpack.c.bf16 %v152_v19, %v145_v18  ;;  %v144_v25 = vld [vmem:[#allocation2 + $0x310] sm:$0xff]  ;;  %v151_v26 = vld [vmem:[#allocation2 + $0x348] sm:$0xff] }
  0x28   :  { %1190 = vmatpush1.bf16.msra.mxu0 %v1189_v62  ;;  %1238 = vmatpush1.bf16.msra.mxu1 %v1237_v63  ;;  %v146_v27 = vld [vmem:[#allocation2 + $0x320] sm:$0xff]  ;;  %v1247_v28 = vpack.c.bf16 %v154_v21, %v147_v20  ;;  %v153_v29 = vld [vmem:[#allocation2 + $0x358] sm:$0xff]  ;;  %v159_v30 = vld [vmem:[#allocation2 + $0x388] sm:$0xff]  ;;  %v1201_v34 = vpack.c.bf16 %v151_v26, %v144_v25 }
  0x29   :  { %1192 = vmatprep.subr.bf16.mxu0 %v1191_v0  ;;  %1240 = vmatprep.subr.bf16.mxu1 %v1239_v4  ;;  %v166_v31 = vld [vmem:[#allocation2 + $0x3c0] sm:$0xff]  ;;  %v161_v32 = vld [vmem:[#allocation2 + $0x398] sm:$0xff]  ;;  %v168_v33 = vld [vmem:[#allocation2 + $0x3d0] sm:$0xff]  ;;  %v1249_v35 = vpack.c.bf16 %v153_v29, %v146_v27 }
  0x2a   :  { %v1203_v36 = vpack.c.bf16 %v166_v31, %v159_v30  ;;  %v158_v37 = vld [vmem:[#allocation2 + $0x380] sm:$0xff]  ;;  %v165_v38 = vld [vmem:[#allocation2 + $0x3b8] sm:$0xff]  ;;  %v160_v39 = vld [vmem:[#allocation2 + $0x390] sm:$0xff]  ;;  %v1251_v40 = vpack.c.bf16 %v168_v33, %v161_v32  ;;  %v1499_v33 = vmov 0.0|0.0  }
  0x2b   :  { %v167_v41 = vld [vmem:[#allocation2 + $0x3c8] sm:$0xff]  ;;  %v173_v42 = vld [vmem:[#allocation2 + $0x3f8] sm:$0xff]  ;;  %v180_v43 = vld [vmem:[#allocation2 + $0x430] sm:$0xff]  ;;  %v1205_v46 = vpack.c.bf16 %v165_v38, %v158_v37 }
  0x2c   :  { %1194 = vmatpush1.bf16.msra.mxu0 %v1193_v10  ;;  %1242 = vmatpush1.bf16.msra.mxu1 %v1241_v11  ;;  %v175_v44 = vld [vmem:[#allocation2 + $0x408] sm:$0xff]  ;;  %v182_v45 = vld [vmem:[#allocation2 + $0x440] sm:$0xff]  ;;  %v1253_v48 = vpack.c.bf16 %v167_v41, %v160_v39  ;;  %v1207_v49 = vpack.c.bf16 %v180_v43, %v173_v42  ;;  %v172_v50 = vld [vmem:[#allocation2 + $0x3f0] sm:$0xff] }
  0x2d   :  { %1196 = vmatprep.subr.bf16.mxu0 %v1195_v12  ;;  %1244 = vmatprep.subr.bf16.mxu1 %v1243_v16  ;;  %v1563_v47 = vld [vmem:[%s1869_s0 + $0x8] sm:$0xff]  ;;  %v174_v52 = vld [vmem:[#allocation2 + $0x400] sm:$0xff]  ;;  %v1255_v53 = vpack.c.bf16 %v182_v45, %v175_v44  ;;  %v181_v54 = vld [vmem:[#allocation2 + $0x438] sm:$0xff] }
  0x2e   :  { %v179_v51 = vld [vmem:[#allocation2 + $0x428] sm:$0xff]  ;;  %v194_v56 = vld [vmem:[#allocation2 + $0x4a0] sm:$0xff]  ;;  %1005 = vmatprep.mubr.msk.f32.mxu0 %vm251_vm0, %v1563_v47  ;;  %v189_v57 = vld [vmem:[#allocation2 + $0x478] sm:$0xff]  ;;  %1006 = vmatprep.mubr.msk.f32.mxu1 %vm251_vm0, %v1563_v47  ;;  %v1257_v60 = vpack.c.bf16 %v181_v54, %v174_v52 }
  0x2f   :  { %v187_v55 = vld [vmem:[#allocation2 + $0x468] sm:$0xff]  ;;  %v196_v58 = vld [vmem:[#allocation2 + $0x4b0] sm:$0xff]  ;;  %v1209_v59 = vpack.c.bf16 %v179_v51, %v172_v50  ;;  %v186_v62 = vld [vmem:[#allocation2 + $0x460] sm:$0xff] }
  0x30   :  { %1198 = vmatpush1.bf16.msra.mxu0 %v1197_v22  ;;  %1246 = vmatpush1.bf16.msra.mxu1 %v1245_v23  ;;  %v1211_v61 = vpack.c.bf16 %v194_v56, %v187_v55  ;;  %v193_v63 = vld [vmem:[#allocation2 + $0x498] sm:$0xff]  ;;  %v188_v0 = vld [vmem:[#allocation2 + $0x470] sm:$0xff]  ;;  %v1259_v1 = vpack.c.bf16 %v196_v58, %v189_v57  ;;  %v195_v2 = vld [vmem:[#allocation2 + $0x4a8] sm:$0xff] }
  0x31   :  { %1200 = vmatprep.subr.bf16.mxu0 %v1199_v24  ;;  %1248 = vmatprep.subr.bf16.mxu1 %v1247_v28  ;;  %v201_v3 = vld [vmem:[#allocation2 + $0x4d8] sm:$0xff]  ;;  %v208_v4 = vld [vmem:[#allocation2 + $0x510] sm:$0xff]  ;;  %v203_v5 = vld [vmem:[#allocation2 + $0x4e8] sm:$0xff]  ;;  %v1213_v7 = vpack.c.bf16 %v193_v63, %v186_v62  ;;  %v1261_v8 = vpack.c.bf16 %v195_v2, %v188_v0 }
  0x32   :  { %v210_v6 = vld [vmem:[#allocation2 + $0x520] sm:$0xff]  ;;  %v1215_v9 = vpack.c.bf16 %v208_v4, %v201_v3  ;;  %v200_v10 = vld [vmem:[#allocation2 + $0x4d0] sm:$0xff]  ;;  %v207_v11 = vld [vmem:[#allocation2 + $0x508] sm:$0xff] }
  0x33   :  { %v202_v12 = vld [vmem:[#allocation2 + $0x4e0] sm:$0xff]  ;;  %v1263_v13 = vpack.c.bf16 %v210_v6, %v203_v5  ;;  %v209_v14 = vld [vmem:[#allocation2 + $0x518] sm:$0xff]  ;;  %v51_v15 = vld [vmem:[#allocation2 + $0x28] sm:$0xff]  ;;  %v1217_v17 = vpack.c.bf16 %v207_v11, %v200_v10 }
  0x34   :  { %1202 = vmatpush1.bf16.msra.mxu0 %v1201_v34  ;;  %1250 = vmatpush1.bf16.msra.mxu1 %v1249_v35  ;;  %v58_v16 = vld [vmem:[#allocation2 + $0x60] sm:$0xff]  ;;  %v1265_v18 = vpack.c.bf16 %v209_v14, %v202_v12  ;;  %v57_v21 = vld [vmem:[#allocation2 + $0x58] sm:$0xff]  ;;  %v72_v23 = vld [vmem:[#allocation2 + $0xd0] sm:$0xff] }
  0x35   :  { %1204 = vmatprep.subr.bf16.mxu0 %v1203_v36  ;;  %1252 = vmatprep.subr.bf16.mxu1 %v1251_v40  ;;  %v1267_v19 = vpack.c.bf16 %v58_v16, %v51_v15  ;;  %v50_v20 = vld [vmem:[#allocation2 + $0x20] sm:$0xff]  ;;  %v65_v22 = vld [vmem:[#allocation2 + $0x98] sm:$0xff]  ;;  %v52_v26 = vld [vmem:[#allocation2 + $0x30] sm:$0xff] }
  0x36   :  { %v1572_v24 = vld [vmem:[%s1869_s0] sm:$0xff]  ;;  %v1269_v25 = vpack.c.bf16 %v57_v21, %v50_v20  ;;  %v1271_v27 = vpack.c.bf16 %v72_v23, %v65_v22  ;;  %v64_v28 = vld [vmem:[#allocation2 + $0x90] sm:$0xff]  ;;  %v71_v29 = vld [vmem:[#allocation2 + $0xc8] sm:$0xff] }
  0x37   :  { %v59_v30 = vld [vmem:[#allocation2 + $0x68] sm:$0xff]  ;;  %v86_v32 = vld [vmem:[#allocation2 + $0x140] sm:$0xff]  ;;  %v73_v36 = vld [vmem:[#allocation2 + $0xd8] sm:$0xff]  ;;  %v1273_v37 = vpack.c.bf16 %v71_v29, %v64_v28 }
  0x38   :  { %1206 = vmatpush1.bf16.msra.mxu0 %v1205_v46  ;;  %1254 = vmatpush1.bf16.msra.mxu1 %v1253_v48  ;;  %v79_v31 = vld [vmem:[#allocation2 + $0x108] sm:$0xff]  ;;  %v1316_v34 = vpack.c.bf16 %v59_v30, %v52_v26  ;;  %v66_v35 = vld [vmem:[#allocation2 + $0xa0] sm:$0xff]  ;;  %v85_v40 = vld [vmem:[#allocation2 + $0x138] sm:$0xff] }
  0x39   :  { %1208 = vmatprep.subr.bf16.mxu0 %v1207_v49  ;;  %1256 = vmatprep.subr.bf16.mxu1 %v1255_v53  ;;  %v1275_v38 = vpack.c.bf16 %v86_v32, %v79_v31  ;;  %v78_v39 = vld [vmem:[#allocation2 + $0x100] sm:$0xff]  ;;  %v93_v41 = vld [vmem:[#allocation2 + $0x178] sm:$0xff]  ;;  %v100_v42 = vld [vmem:[#allocation2 + $0x1b0] sm:$0xff]  ;;  %v1319_v43 = vpack.c.bf16 %v73_v36, %v66_v35 }
  0x3a   :  { %v80_v44 = vld [vmem:[#allocation2 + $0x110] sm:$0xff]  ;;  %v87_v45 = vld [vmem:[#allocation2 + $0x148] sm:$0xff]  ;;  %v1277_v46 = vpack.c.bf16 %v85_v40, %v78_v39  ;;  %v1279_v48 = vpack.c.bf16 %v100_v42, %v93_v41  ;;  %v114_v52 = vld [vmem:[#allocation2 + $0x220] sm:$0xff] }
  0x3b   :  { %v92_v49 = vld [vmem:[#allocation2 + $0x170] sm:$0xff]  ;;  %v99_v50 = vld [vmem:[#allocation2 + $0x1a8] sm:$0xff]  ;;  %v1322_v53 = vpack.c.bf16 %v87_v45, %v80_v44  ;;  %v94_v54 = vld [vmem:[#allocation2 + $0x180] sm:$0xff] }
  0x3c   :  { %1210 = vmatpush1.bf16.msra.mxu0 %v1209_v59  ;;  %1258 = vmatpush1.bf16.msra.mxu1 %v1257_v60  ;;  %v107_v51 = vld [vmem:[#allocation2 + $0x1e8] sm:$0xff]  ;;  %v101_v55 = vld [vmem:[#allocation2 + $0x1b8] sm:$0xff]  ;;  %v106_v57 = vld [vmem:[#allocation2 + $0x1e0] sm:$0xff] }
  0x3d   :  { %1212 = vmatprep.subr.bf16.mxu0 %v1211_v61  ;;  %1260 = vmatprep.subr.bf16.mxu1 %v1259_v1  ;;  %v1283_v56 = vpack.c.bf16 %v114_v52, %v107_v51  ;;  %v113_v58 = vld [vmem:[#allocation2 + $0x218] sm:$0xff]  ;;  %v128_v60 = vld [vmem:[#allocation2 + $0x290] sm:$0xff]  ;;  %v1325_v61 = vpack.c.bf16 %v101_v55, %v94_v54  ;;  %v115_v63 = vld [vmem:[#allocation2 + $0x228] sm:$0xff] }
  0x3e   :  { %v121_v59 = vld [vmem:[#allocation2 + $0x258] sm:$0xff]  ;;  %v108_v62 = vld [vmem:[#allocation2 + $0x1f0] sm:$0xff]  ;;  %v1285_v0 = vpack.c.bf16 %v113_v58, %v106_v57  ;;  %v127_v3 = vld [vmem:[#allocation2 + $0x288] sm:$0xff] }
  0x3f   :  { %v1287_v1 = vpack.c.bf16 %v128_v60, %v121_v59  ;;  %v120_v2 = vld [vmem:[#allocation2 + $0x250] sm:$0xff]  ;;  %v135_v4 = vld [vmem:[#allocation2 + $0x2c8] sm:$0xff]  ;;  %v142_v5 = vld [vmem:[#allocation2 + $0x300] sm:$0xff]  ;;  %v1328_v6 = vpack.c.bf16 %v115_v63, %v108_v62 }
  0x40   :  { %1214 = vmatpush1.bf16.msra.mxu0 %v1213_v7  ;;  %1262 = vmatpush1.bf16.msra.mxu1 %v1261_v8  ;;  %v122_v7 = vld [vmem:[#allocation2 + $0x260] sm:$0xff]  ;;  %v129_v8 = vld [vmem:[#allocation2 + $0x298] sm:$0xff]  ;;  %v1291_v10 = vpack.c.bf16 %v142_v5, %v135_v4  ;;  %v156_v14 = vld [vmem:[#allocation2 + $0x370] sm:$0xff] }
  0x41   :  { %1216 = vmatprep.subr.bf16.mxu0 %v1215_v9  ;;  %1264 = vmatprep.subr.bf16.mxu1 %v1263_v13  ;;  %v1289_v9 = vpack.c.bf16 %v127_v3, %v120_v2  ;;  %v134_v11 = vld [vmem:[#allocation2 + $0x2c0] sm:$0xff]  ;;  %v141_v12 = vld [vmem:[#allocation2 + $0x2f8] sm:$0xff]  ;;  %v1331_v15 = vpack.c.bf16 %v129_v8, %v122_v7  ;;  %v136_v16 = vld [vmem:[#allocation2 + $0x2d0] sm:$0xff] }
  0x42   :  { %v149_v13 = vld [vmem:[#allocation2 + $0x338] sm:$0xff]  ;;  %v148_v20 = vld [vmem:[#allocation2 + $0x330] sm:$0xff]  ;;  %v155_v21 = vld [vmem:[#allocation2 + $0x368] sm:$0xff] }
  0x43   :  { %v163_v22 = vld [vmem:[#allocation2 + $0x3a8] sm:$0xff]  ;;  %v170_v23 = vld [vmem:[#allocation2 + $0x3e0] sm:$0xff]  ;;  %v1297_v26 = vpack.c.bf16 %v155_v21, %v148_v20  ;;  %v169_v29 = vld [vmem:[#allocation2 + $0x3d8] sm:$0xff] }
  0x44   :  { %1218 = vmatpush1.bf16.msra.mxu0 %v1217_v17  ;;  %1266 = vmatpush1.bf16.msra.mxu1 %v1265_v18  ;;  %v143_v17 = vld [vmem:[#allocation2 + $0x308] sm:$0xff]  ;;  %v1293_v18 = vpack.c.bf16 %v141_v12, %v134_v11  ;;  %v162_v28 = vld [vmem:[#allocation2 + $0x3a0] sm:$0xff]  ;;  %v177_v30 = vld [vmem:[#allocation2 + $0x418] sm:$0xff] }
  0x45   :  { %1268 = vmatprep.subr.bf16.mxu0 %v1267_v19  ;;  %1315 = vmatprep.subr.bf16.mxu1 %v1499_v33  ;;  %v1295_v19 = vpack.c.bf16 %v156_v14, %v149_v13  ;;  %v184_v31 = vld [vmem:[#allocation2 + $0x450] sm:$0xff]  ;;  %v1301_v32 = vpack.c.bf16 %v169_v29, %v162_v28  ;;  %v183_v36 = vld [vmem:[#allocation2 + $0x448] sm:$0xff]  ;;  %v190_v41 = vld [vmem:[#allocation2 + $0x480] sm:$0xff] }
  0x46   :  { %v176_v35 = vld [vmem:[#allocation2 + $0x410] sm:$0xff]  ;;  %v197_v42 = vld [vmem:[#allocation2 + $0x4b8] sm:$0xff]  ;;  %v150_v51 = vld [vmem:[#allocation2 + $0x340] sm:$0xff] }
  0x47   :  { %320 = vmatmul.mubr.f32.vlgmr.msra.gmra.mrb[0].mxu0 %v1572_v24  ;;  %391 = vmatmul.mubr.f32.vlgmr.msra.gmra.mrb[0].mxu1 %v1572_v24  ;;  %v1305_v39 = vpack.c.bf16 %v183_v36, %v176_v35  ;;  %v212_v44 = vld [vmem:[#allocation2 + $0x530] sm:$0xff]  ;;  %v1309_v45 = vpack.c.bf16 %v197_v42, %v190_v41  ;;  %v157_v52 = vld [vmem:[#allocation2 + $0x378] sm:$0xff]  ;;  %v171_v55 = vld [vmem:[#allocation2 + $0x3e8] sm:$0xff] }
  0x48   :  { %1270 = vmatpush1.bf16.msra.mxu0 %v1269_v25  ;;  %1007 = vmatprep.mubr.msk.f32.mxu0 %vm251_vm0, %v1563_v47  ;;  %v1334_v25 = vpack.c.bf16 %v143_v17, %v136_v16  ;;  %v164_v54 = vld [vmem:[#allocation2 + $0x3b0] sm:$0xff]  ;;  %v185_v57 = vld [vmem:[#allocation2 + $0x458] sm:$0xff]  ;;  %v557_v58 = vld [vmem:[%s1872_s3 + $0x80] sm:$0xff] }
  0x49   :  { %1272 = vmatprep.subr.bf16.mxu0 %v1271_v27  ;;  %1317 = vmatpush1.bf16.msra.mxu1 %v1316_v34  ;;  %v1299_v27 = vpack.c.bf16 %v170_v23, %v163_v22  ;;  %v1303_v34 = vpack.c.bf16 %v184_v31, %v177_v30  ;;  %v558_v60 = vld [vmem:[%s1872_s3 + $0x88] sm:$0xff]  ;;  %v192_v63 = vld [vmem:[#allocation2 + $0x490] sm:$0xff]  ;;  %v560_v4 = vld [vmem:[%s1872_s3 + $0x98] sm:$0xff] }
  0x4a   :  { %1008 = vmatprep.mubr.msk.f32.mxu1 %vm251_vm0, %v1563_v47  ;;  %1318 = vmatprep.subr.bf16.mxu1 %v1499_v33  ;;  %v1281_v47 = vpack.c.bf16 %v99_v50, %v92_v49  ;;  %v211_v49 = vld [vmem:[#allocation2 + $0x528] sm:$0xff]  ;;  %v559_v3 = vld [vmem:[%s1872_s3 + $0x90] sm:$0xff]  ;;  %v561_v8 = vld [vmem:[%s1872_s3 + $0xa0] sm:$0xff] }
  0x4b   :  { %v542_v62 = vld [vmem:[%s1872_s3 + $0x8] sm:$0xff]  ;;  %v543_v5 = vld [vmem:[%s1872_s3 + $0x10] sm:$0xff]  ;;  %v1355_v7 = vpack.c.bf16 %v560_v4, %v559_v3  ;;  %v213_v13 = vld [vmem:[#allocation2 + $0x538] sm:$0xff] }
  0x4c   :  { %1274 = vmatpush1.bf16.msra.mxu0 %v1273_v37  ;;  %v191_v37 = vld [vmem:[#allocation2 + $0x488] sm:$0xff]  ;;  %v563_v17 = vld [vmem:[%s1872_s3 + $0xb0] sm:$0xff]  ;;  %v573_v20 = vld [vmem:[%s1872_s3 + $0x100] sm:$0xff] }
  0x4d   :  { %1276 = vmatprep.subr.bf16.mxu0 %v1275_v38  ;;  %1320 = vmatpush1.bf16.msra.mxu1 %v1319_v43  ;;  %v198_v38 = vld [vmem:[#allocation2 + $0x4c0] sm:$0xff]  ;;  %v205_v43 = vld [vmem:[#allocation2 + $0x4f8] sm:$0xff]  ;;  %v562_v12 = vld [vmem:[%s1872_s3 + $0xa8] sm:$0xff] }
  0x4e   :  { %1321 = vmatprep.subr.bf16.mxu1 %v1499_v33  ;;  %v1307_v40 = vpack.c.bf16 %v198_v38, %v191_v37  ;;  %v1359_v14 = vpack.c.bf16 %v562_v12, %v561_v8  ;;  %v546_v16 = vld [vmem:[%s1872_s3 + $0x28] sm:$0xff]  ;;  %v575_v30 = vld [vmem:[%s1872_s3 + $0x110] sm:$0xff]  ;;  %v549_v35 = vld [vmem:[%s1872_s3 + $0x40] sm:$0xff] }
  0x4f   :  { %v574_v22 = vld [vmem:[%s1872_s3 + $0x108] sm:$0xff]  ;;  %v567_v37 = vld [vmem:[%s1872_s3 + $0xd0] sm:$0xff]  ;;  %v568_v38 = vld [vmem:[%s1872_s3 + $0xd8] sm:$0xff] }
  0x50   :  { %1278 = vmatpush1.bf16.msra.mxu0 %v1277_v46  ;;  %v1311_v46 = vpack.c.bf16 %v212_v44, %v205_v43  ;;  %v566_v28 = vld [vmem:[%s1872_s3 + $0xc8] sm:$0xff]  ;;  %v1384_v29 = vpack.c.bf16 %v574_v22, %v573_v20  ;;  %v1371_v43 = vpack.c.bf16 %v568_v38, %v567_v37  ;;  %v552_v44 = vld [vmem:[%s1872_s3 + $0x58] sm:$0xff]  ;;  %v555_v4 = vld [vmem:[%s1872_s3 + $0x70] sm:$0xff] }
  0x51   :  { %1280 = vmatprep.subr.bf16.mxu0 %v1279_v48  ;;  %1323 = vmatpush1.bf16.msra.mxu1 %v1322_v53  ;;  %v204_v48 = vld [vmem:[#allocation2 + $0x4f0] sm:$0xff]  ;;  %v1337_v53 = vpack.c.bf16 %v157_v52, %v150_v51  ;;  %v550_v36 = vld [vmem:[%s1872_s3 + $0x48] sm:$0xff]  ;;  %v580_v51 = vld [vmem:[%s1872_s3 + $0x138] sm:$0xff] }
  0x52   :  { %1324 = vmatprep.subr.bf16.mxu1 %v1499_v33  ;;  %v1313_v50 = vpack.c.bf16 %v211_v49, %v204_v48  ;;  %v1369_v41 = vpack.c.bf16 %v550_v36, %v549_v35  ;;  %v578_v42 = vld [vmem:[%s1872_s3 + $0x128] sm:$0xff]  ;;  %v579_v49 = vld [vmem:[%s1872_s3 + $0x130] sm:$0xff]  ;;  %v588_v8 = vld [vmem:[%s1872_s3 + $0x178] sm:$0xff] }
  0x54   :  { %1282 = vmatpush1.bf16.msra.mxu0 %v1281_v47  ;;  %v178_v47 = vld [vmem:[#allocation2 + $0x420] sm:$0xff] }
  0x55   :  { %1284 = vmatprep.subr.bf16.mxu0 %v1283_v56  ;;  %1326 = vmatpush1.bf16.msra.mxu1 %v1325_v61  ;;  %v1340_v56 = vpack.c.bf16 %v171_v55, %v164_v54  ;;  %v1343_v59 = vpack.c.bf16 %v185_v57, %v178_v47  ;;  %v541_v61 = vld [vmem:[%s1872_s3] sm:$0xff]  ;;  %v554_v54 = vld [vmem:[%s1872_s3 + $0x68] sm:$0xff]  ;;  %v1393_v55 = vpack.c.bf16 %v580_v51, %v579_v49 }
  0x56   :  { %1327 = vmatprep.subr.bf16.mxu1 %v1499_v33  ;;  %v1353_v2 = vpack.c.bf16 %v542_v62, %v541_v61  ;;  %v582_v57 = vld [vmem:[%s1872_s3 + $0x148] sm:$0xff]  ;;  %v585_v62 = vld [vmem:[%s1872_s3 + $0x160] sm:$0xff] }
  0x58   :  { %1286 = vmatpush1.bf16.msra.mxu0 %v1285_v0  ;;  %v199_v0 = vld [vmem:[#allocation2 + $0x4c8] sm:$0xff] }
  0x59   :  { %1288 = vmatprep.subr.bf16.mxu0 %v1287_v1  ;;  %1329 = vmatpush1.bf16.msra.mxu1 %v1328_v6  ;;  %v1351_v1 = vpack.c.bf16 %v558_v60, %v557_v58  ;;  %v544_v6 = vld [vmem:[%s1872_s3 + $0x18] sm:$0xff] }
  0x5a   :  { %1330 = vmatprep.subr.bf16.mxu1 %v1499_v33  ;;  %v1357_v11 = vpack.c.bf16 %v544_v6, %v543_v5  ;;  %v584_v60 = vld [vmem:[%s1872_s3 + $0x158] sm:$0xff]  ;;  %v587_v6 = vld [vmem:[%s1872_s3 + $0x170] sm:$0xff] }
  0x5b   :  { %v556_v5 = vld [vmem:[%s1872_s3 + $0x78] sm:$0xff] }
  0x5c   :  { %1290 = vmatpush1.bf16.msra.mxu0 %v1289_v9  ;;  %v1346_v9 = vpack.c.bf16 %v199_v0, %v192_v63  ;;  %v586_v63 = vld [vmem:[%s1872_s3 + $0x168] sm:$0xff] }
  0x5d   :  { %1292 = vmatprep.subr.bf16.mxu0 %v1291_v10  ;;  %1332 = vmatpush1.bf16.msra.mxu1 %v1331_v15  ;;  %v206_v10 = vld [vmem:[#allocation2 + $0x500] sm:$0xff]  ;;  %v1402_v0 = vpack.c.bf16 %v586_v63, %v585_v62  ;;  %v897_v62 = vld [vmem:[%s1875_s6 + $0x8] sm:$0xff]  ;;  %v898_v63 = vld [vmem:[%s1875_s6 + $0x10] sm:$0xff] }
  0x5e   :  { %1333 = vmatprep.subr.bf16.mxu1 %v1499_v33  ;;  %v545_v15 = vld [vmem:[%s1872_s3 + $0x20] sm:$0xff] }
  0x5f   :  { %v1361_v21 = vpack.c.bf16 %v546_v16, %v545_v15 }
  0x60   :  { %1294 = vmatpush1.bf16.msra.mxu0 %v1293_v18  ;;  %v564_v18 = vld [vmem:[%s1872_s3 + $0xb8] sm:$0xff] }
  0x61   :  { %1296 = vmatprep.subr.bf16.mxu0 %v1295_v19  ;;  %1335 = vmatpush1.bf16.msra.mxu1 %v1334_v25  ;;  %v1349_v19 = vpack.c.bf16 %v213_v13, %v206_v10  ;;  %v1363_v23 = vpack.c.bf16 %v564_v18, %v563_v17  ;;  %v547_v25 = vld [vmem:[%s1872_s3 + $0x30] sm:$0xff]  ;;  %v1501_v10 = vmov 0.0  }
  0x62   :  { %1336 = vmatprep.subr.bf16.mxu1 %v1499_v33 }
  0x64   :  { %1298 = vmatpush1.bf16.msra.mxu0 %v1297_v26  ;;  %v548_v26 = vld [vmem:[%s1872_s3 + $0x38] sm:$0xff] }
  0x65   :  { %1300 = vmatprep.subr.bf16.mxu0 %v1299_v27  ;;  %1338 = vmatpush1.bf16.msra.mxu1 %v1337_v53  ;;  %v565_v27 = vld [vmem:[%s1872_s3 + $0xc0] sm:$0xff]  ;;  %v1365_v31 = vpack.c.bf16 %v548_v26, %v547_v25 }
  0x66   :  { %1339 = vmatprep.subr.bf16.mxu1 %v1499_v33  ;;  %v553_v53 = vld [vmem:[%s1872_s3 + $0x60] sm:$0xff] }
  0x67   :  { %v1377_v47 = vpack.c.bf16 %v554_v54, %v553_v53  ;;  %v737_v53 = vld [vmem:[%s1873_s4 + $0x8] sm:$0xff] }
  0x68   :  { %1302 = vmatpush1.bf16.msra.mxu0 %v1301_v32  ;;  %v576_v32 = vld [vmem:[%s1872_s3 + $0x118] sm:$0xff] }
  0x69   :  { %1304 = vmatprep.subr.bf16.mxu0 %v1303_v34  ;;  %1341 = vmatpush1.bf16.msra.mxu1 %v1340_v56  ;;  %v1367_v34 = vpack.c.bf16 %v566_v28, %v565_v27  ;;  %v581_v56 = vld [vmem:[%s1872_s3 + $0x140] sm:$0xff] }
  0x6a   :  { %1342 = vmatprep.subr.bf16.mxu1 %v1499_v33  ;;  %v1396_v58 = vpack.c.bf16 %v582_v57, %v581_v56 }
  0x6c   :  { %1306 = vmatpush1.bf16.msra.mxu0 %v1305_v39  ;;  %v1387_v39 = vpack.c.bf16 %v576_v32, %v575_v30 }
  0x6d   :  { %1308 = vmatprep.subr.bf16.mxu0 %v1307_v40  ;;  %1344 = vmatpush1.bf16.msra.mxu1 %v1343_v59  ;;  %v577_v40 = vld [vmem:[%s1872_s3 + $0x120] sm:$0xff]  ;;  %v583_v59 = vld [vmem:[%s1872_s3 + $0x150] sm:$0xff] }
  0x6e   :  { %1345 = vmatprep.subr.bf16.mxu1 %v1499_v33  ;;  %v1390_v48 = vpack.c.bf16 %v578_v42, %v577_v40  ;;  %v1399_v61 = vpack.c.bf16 %v584_v60, %v583_v59  ;;  %v821_v59 = vld [vmem:[%s1874_s5 + $0x8] sm:$0xff] }
  0x70   :  { %1310 = vmatpush1.bf16.msra.mxu0 %v1309_v45  ;;  %v569_v45 = vld [vmem:[%s1872_s3 + $0xe0] sm:$0xff] }
  0x71   :  { %1312 = vmatprep.subr.bf16.mxu0 %v1311_v46  ;;  %1347 = vmatpush1.bf16.msra.mxu1 %v1346_v9  ;;  %v570_v46 = vld [vmem:[%s1872_s3 + $0xe8] sm:$0xff]  ;;  %v1405_v9 = vpack.c.bf16 %v588_v8, %v587_v6  ;;  %v902_v6 = vld [vmem:[%s1875_s6 + $0x30] sm:$0xff] }
  0x72   :  { %1348 = vmatprep.subr.bf16.mxu1 %v1499_v33  ;;  %v1375_v52 = vpack.c.bf16 %v570_v46, %v569_v45 }
  0x74   :  { %1314 = vmatpush1.bf16.msra.mxu0 %v1313_v50 }
  0x75   :  { %1352 = vmatprep.subr.bf16.mxu0 %v1351_v1  ;;  %1350 = vmatpush1.bf16.msra.mxu1 %v1349_v19  ;;  %v571_v1 = vld [vmem:[%s1872_s3 + $0xf0] sm:$0xff] }
  0x76   :  { %1383 = vmatprep.subr.bf16.mxu1 %v1499_v33 }
  0x77   :  { %462 = vmatmul.mubr.f32.vlgmr.msra.gmra.mrb[2].mxu0 %v1572_v24 }
  0x78   :  { %1354 = vmatpush3.bf16.msra.mxu0 %v1353_v2  ;;  %533 = vmatmul.mubr.f32.vlgmr.msra.gmra.mrb[2].mxu1 %v1572_v24  ;;  %v551_v24 = vld [vmem:[%s1872_s3 + $0x50] sm:$0xff]  ;;  %v572_v2 = vld [vmem:[%s1872_s3 + $0xf8] sm:$0xff] }
  0x79   :  { %1356 = vmatprep.subr.bf16.mxu0 %v1355_v7  ;;  %1385 = vmatpush3.bf16.msra.mxu1 %v1384_v29  ;;  %v1373_v50 = vpack.c.bf16 %v552_v44, %v551_v24  ;;  %v1379_v3 = vpack.c.bf16 %v572_v2, %v571_v1  ;;  %v1381_v7 = vpack.c.bf16 %v556_v5, %v555_v4  ;;  %v899_v1 = vld [vmem:[%s1875_s6 + $0x18] sm:$0xff]  ;;  %v901_v4 = vld [vmem:[%s1875_s6 + $0x28] sm:$0xff] }
  0x7a   :  { %1386 = vmatprep.subr.bf16.mxu1 %v1499_v33  ;;  %1119 = vmatprep.mubr.msk.f32.mxu1 %vm1500_vm1, %v1501_v10  ;;  %v1417_v2 = vpack.c.bf16 %v899_v1, %v898_v63 }
  0x7c   :  { %1358 = vmatpush3.bf16.msra.mxu0 %v1357_v11  ;;  %v216_v11 = vlaneseq }
  0x7d   :  { %1360 = vmatprep.subr.bf16.mxu0 %v1359_v14  ;;  %1388 = vmatpush3.bf16.msra.mxu1 %v1387_v39  ;;  %v1757_v14 = vld [vmem:[%s1871_s2] sm:$0xff] }
  0x7e   :  { %1389 = vmatprep.subr.bf16.mxu1 %v1499_v33  ;;  %v1751_v12 = vshrl.u32 %v216_v11, 7 }
  0x80   :  { %1362 = vmatpush3.bf16.msra.mxu0 %v1361_v21  ;;  %v218_v13 = vsub.s32 0, %v1751_v12  ;;  %v230_v15 = vsub.s32 3, %v1751_v12  ;;  %v226_v26 = vsub.s32 2, %v1751_v12  ;;  %v222_v27 = vsub.s32 1, %v1751_v12 }
  0x81   :  { %1364 = vmatprep.subr.bf16.mxu0 %v1363_v23  ;;  %1391 = vmatpush3.bf16.msra.mxu1 %v1390_v48  ;;  %v234_v28 = vsub.s32 4, %v1751_v12  ;;  %v238_v29 = vsub.s32 5, %v1751_v12 }
  0x82   :  { %1392 = vmatprep.subr.bf16.mxu1 %v1499_v33  ;;  %v219_v16 = vrot.slane %v1757_v14, %v218_v13  ;;  %v231_v17 = vrot.slane %v1757_v14, %v230_v15  ;;  %v227_v30 = vrot.slane %v1757_v14, %v226_v26  ;;  %v905_v13 = vld [vmem:[%s1875_s6 + $0x48] sm:$0xff] }
  0x83   :  { %v235_v32 = vrot.slane %v1757_v14, %v234_v28 }
  0x84   :  { %1366 = vmatpush3.bf16.msra.mxu0 %v1365_v31  ;;  %v223_v31 = vrot.slane %v1757_v14, %v222_v27 }
  0x85   :  { %1368 = vmatprep.subr.bf16.mxu0 %v1367_v34  ;;  %1394 = vmatpush3.bf16.msra.mxu1 %v1393_v55  ;;  %v239_v34 = vrot.slane %v1757_v14, %v238_v29 }
  0x86   :  { %1395 = vmatprep.subr.bf16.mxu1 %v1499_v33 }
  0x88   :  { %1370 = vmatpush3.bf16.msra.mxu0 %v1369_v41 }
  0x89   :  { %1372 = vmatprep.subr.bf16.mxu0 %v1371_v43  ;;  %1397 = vmatpush3.bf16.msra.mxu1 %v1396_v58  ;;  %v820_v58 = vld [vmem:[%s1874_s5] sm:$0xff] }
  0x8a   :  { %1398 = vmatprep.subr.bf16.mxu1 %v1499_v33  ;;  %v1411_v60 = vpack.c.bf16 %v821_v59, %v820_v58 }
  0x8c   :  { %1374 = vmatpush3.bf16.msra.mxu0 %v1373_v50 }
  0x8d   :  { %1376 = vmatprep.subr.bf16.mxu0 %v1375_v52  ;;  %1400 = vmatpush3.bf16.msra.mxu1 %v1399_v61  ;;  %v736_v52 = vld [vmem:[%s1873_s4] sm:$0xff] }
  0x8e   :  { %1401 = vmatprep.subr.bf16.mxu1 %v1499_v33  ;;  %v1408_v54 = vpack.c.bf16 %v737_v53, %v736_v52  ;;  %v896_v61 = vld [vmem:[%s1875_s6] sm:$0xff] }
  0x90   :  { %1378 = vmatpush3.bf16.msra.mxu0 %v1377_v47 }
  0x91   :  { %1403 = vmatpush3.bf16.msra.mxu1 %v1402_v0  ;;  %1380 = vmatprep.subr.bf16.mxu0 %v1379_v3  ;;  %v1414_v0 = vpack.c.bf16 %v897_v62, %v896_v61  ;;  %v900_v3 = vld [vmem:[%s1875_s6 + $0x20] sm:$0xff] }
  0x92   :  { %1404 = vmatprep.subr.bf16.mxu1 %v1499_v33  ;;  %v1420_v5 = vpack.c.bf16 %v901_v4, %v900_v3 }
  0x94   :  { %1382 = vmatpush3.bf16.msra.mxu0 %v1381_v7  ;;  %v903_v7 = vld [vmem:[%s1875_s6 + $0x38] sm:$0xff] }
  0x95   :  { %1406 = vmatpush3.bf16.msra.mxu1 %v1405_v9  ;;  %1413 = vmatprep.subr.bf16.mxu0 %v1499_v33  ;;  %v1423_v8 = vpack.c.bf16 %v903_v7, %v902_v6  ;;  %v904_v9 = vld [vmem:[%s1875_s6 + $0x40] sm:$0xff] }
  0x96   :  { %1407 = vmatprep.subr.bf16.mxu1 %v1499_v33  ;;  %v1426_v15 = vpack.c.bf16 %v905_v13, %v904_v9 }
 0x11a   :  { %v321_v18 = vpop.f32.mrb[0].mxu0  ;;  %v392_v20 = vpop.f32.mrb[0].mxu1 }
 0x11b   :  { %v322_v19 = vadd.f32 %v321_v18, %v219_v16  ;;  %v323_v21 = vpop.f32.mrb[1].mxu0  ;;  %v394_v22 = vpop.f32.mrb[1].mxu1  ;;  %v393_v35 = vadd.f32 %v392_v20, %v227_v30  ;;  %v906_v16 = vld [vmem:[%s1875_s6 + $0x50] sm:$0xff]  ;;  %v909_v20 = vld [vmem:[%s1875_s6 + $0x68] sm:$0xff] }
 0x11c   :  { %v395_v23 = vadd.f32 %v394_v22, %v231_v17  ;;  %v324_v37 = vadd.f32 %v323_v21, %v223_v31  ;;  %v907_v17 = vld [vmem:[%s1875_s6 + $0x58] sm:$0xff]  ;;  %v739_v22 = vand.u32 127, %v216_v11 }
 0x11d   :  { %v1429_v18 = vpack.c.bf16 %v907_v17, %v906_v16  ;;  %v911_v11 = vld [vmem:[%s1875_s6 + $0x78] sm:$0xff] }
 0x11e   :  { %v538_v25 = vmul.f32 %v395_v23, %v322_v19  ;;  %v908_v19 = vld [vmem:[%s1875_s6 + $0x60] sm:$0xff]  ;;  %vm740_vm3 = vcmp.ge.s32.totalorder %v739_v22, 9 }
 0x11f   :  { %v1432_v21 = vpack.c.bf16 %v909_v20, %v908_v19  ;;  %v741_v23 = vsel %vm740_vm3, 1.0, %v1501_v10 }
 0x14a   :  { %v463_v36 = vpop.f32.mrb[2].mxu0 }
 0x14b   :  { %v464_v38 = vadd.f32 %v463_v36, %v235_v32  ;;  %v465_v39 = vpop.f32.mrb[3].mxu0  ;;  %v1774_v43 = vpop.f32.mrb[2].mxu1 }
 0x14c   :  { %v466_v40 = vadd.f32 %v465_v39, %v239_v34  ;;  %v536_v24 = vpop.f32.mrb[3].mxu1  ;;  %v242_v34 = vsub.s32 6, %v1751_v12 }
 0x14d   :  { %v539_v41 = vmul.f32 %v464_v38, %v324_v37 }
 0x14e   :  { %v540_v42 = vmul.f32 %v466_v40, %v393_v35  ;;  %v243_v35 = vrot.slane %v1757_v14, %v242_v34  ;;  %v1011_v40 = vld [vmem:[%s1876_s7] ss:$0 sm:$0xff] }
 0x14f   :  { %653 = vmatprep.mubr.f32.mxu0 %v539_v41 }
 0x150   :  { %654 = vmatmul.mubr.f32.vlgmr.msra.gmra.mrb[4].mxu0 %v538_v25  ;;  %1120 = vmatmul.mubr.f32.vlgmr.msra.gmra.mrb[4].mxu1 %v540_v42  ;;  %v535_v36 = vadd.f32 %v1774_v43, %v243_v35 }
 0x151   :  { %1126 = vmatprep.mubr.msk.f32.mxu1 %vm1500_vm1, %v1501_v10  ;;  %1168 = vmatprep.mubr.msk.f32.mxu0 %vm1500_vm1, %v1501_v10 }
 0x152   :  { %1409 = vmatpush3.bf16.msra.mxu1 %v1408_v54  ;;  %1415 = vmatpush3.bf16.msra.mxu0 %v1414_v0 }
 0x153   :  { %1410 = vmatprep.subr.bf16.mxu1 %v1499_v33  ;;  %1416 = vmatprep.subr.bf16.mxu0 %v1499_v33 }
 0x156   :  { %1418 = vmatpush3.bf16.msra.mxu0 %v1417_v2 }
 0x157   :  { %1419 = vmatprep.subr.bf16.mxu0 %v1499_v33 }
 0x15a   :  { %1421 = vmatpush3.bf16.msra.mxu0 %v1420_v5 }
 0x15b   :  { %1422 = vmatprep.subr.bf16.mxu0 %v1499_v33 }
 0x15e   :  { %1424 = vmatpush3.bf16.msra.mxu0 %v1423_v8 }
 0x15f   :  { %1425 = vmatprep.subr.bf16.mxu0 %v1499_v33 }
 0x162   :  { %1427 = vmatpush3.bf16.msra.mxu0 %v1426_v15 }
 0x163   :  { %1428 = vmatprep.subr.bf16.mxu0 %v1499_v33 }
 0x166   :  { %1430 = vmatpush3.bf16.msra.mxu0 %v1429_v18 }
 0x167   :  { %1431 = vmatprep.subr.bf16.mxu0 %v1499_v33 }
 0x16a   :  { %1433 = vmatpush3.bf16.msra.mxu0 %v1432_v21 }
 0x16b   :  { %1434 = vmatprep.subr.bf16.mxu0 %v1499_v33  ;;  %v910_v33 = vld [vmem:[%s1875_s6 + $0x70] sm:$0xff]  ;;  %s1470_s6 = scalar_lea.vmem %s997_s13, 128 }
 0x16c   :  { %p1471_p8 = scmp.ne.s32.totalorder %s997_s13, %s1470_s6  ;;  %p1476_p10 = scmp.lt.s32.totalorder %s1470_s6, %s1470_s6 }
 0x16e   :  { %p1477_p11 = por %p1476_p10, %p1475_p9 }
 0x170   :  { %p1478_p12 = pnand %p1477_p11, %p1471_p8 }
 0x223   :  { %v1044_v44 = vpop.f32.mrb[4].mxu0  ;;  %v725_v45 = vpop.f32.mrb[4].mxu1 }
 0x224   :  { %v1045_v46 = vpop.f32.mrb[5].mxu0  ;;  %v1121_v48 = vpop.f32.mrb[5].mxu1 }
 0x225   :  { %v1046_v49 = vadd.f32 %v1045_v46, %v1044_v44 }
 0x227   :  { %v726_v50 = vadd.f32 %v1046_v49, %v725_v45 }
 0x229   :  { %v730_v51 = vsel %vm729_vm2, %v726_v50, -inf }
 0x22a   :  { %731 = vmax.xlane.f32.xlu0 %v730_v51 }
 0x2b7   :  { %v732_v55 = vpop.xlane.xlu0 %731 }
 0x2b8   :  { %v733_v47 = vsub.f32 %v726_v50, %v732_v55 }
 0x2ba   :  { %v734_v56 = vmul.f32 1.442695, %v733_v47 }
 0x2bc   :  { %1444 = vpow2.f32 %v734_v56 }
 0x2c6   :  { %v1445_v57 = vpop.eup %1444 }
 0x2c7   :  { %1127 = vmatmul.mubr.msk.f32.vlgmr.msra.gmra.mrb[6].mxu1 %vm729_vm2, %v1445_v57 }
 0x2c8   :  { %1133 = vmatprep.mubr.msk.f32.mxu1 %vm1500_vm1, %v1501_v10  ;;  %1412 = vmatpush3.bf16.msra.mxu1 %v1411_v60  ;;  %v1435_v10 = vpack.c.bf16 %v911_v11, %v910_v33 }
 0x2ca   :  { %1436 = vmatpush3.bf16.msra.mxu0 %v1435_v10 }
 0x39a   :  { %v811_v25 = vpop.f32.mrb[6].mxu1 }
 0x39b   :  { %v812_v26 = vadd.f32 %v811_v25, %v741_v23  ;;  %v1128_v27 = vpop.f32.mrb[7].mxu1 }
 0x39d   :  { %1446 = vrcp.f32 %v812_v26 }
 0x3a7   :  { %v1447_v28 = vpop.eup %1446 }
 0x3a8   :  { %v816_v29 = vmul.f32 %v1447_v28, %v812_v26 }
 0x3aa   :  { %v817_v30 = vsub.f32 2.0, %v816_v29 }
 0x3ac   :  { %v818_v31 = vmul.f32 %v1447_v28, %v817_v30 }
 0x3ae   :  { %v819_v32 = vmul.f32 %v1445_v57, %v818_v31 }
 0x3b0   :  { %1134 = vmatmul.mubr.msk.f32.vlgmr.msra.gmra.mrb[8].mxu1 %vm729_vm2, %v819_v32 }
 0x483   :  { %v891_v37 = vpop.f32.mrb[8].mxu1 }
 0x484   :  { %v895_v38 = vmul.f32 %v891_v37, %v535_v36  ;;  %v1135_v39 = vpop.f32.mrb[9].mxu1 }
 0x486   :  { %1169 = vmatmul.mubr.f32.vlgmr.msra.gmra.mrb[6].mxu0 %v895_v38 }
 0x559   :  { %v985_v41 = vpop.f32.mrb[6].mxu0 }
 0x55a   :  { %v986_v42 = vadd.f32 %v1011_v40, %v985_v41  ;;  %v1170_v24 = vpop.f32.mrb[7].mxu0 }
 0x55c   :  { %989 = vst [vmem:[#allocation5] sm:$0xff] %v986_v42 }
 0x55d   :  { %1481 = shalt.err (!%p1478_p12)
}
 0x55e   :  { %s1482_s15 = scalar_lea.hbm %s1877_s8, 128 }
 0x55f   :  { %p1483_p13 = scmp.ne.s32.totalorder %s1877_s8, %s1482_s15  ;;  %p1486_p0 = scmp.lt.u32.totalorder %s1482_s15, %s1877_s8 }
 0x561   :  { %p1488_p1 = pnand %p1486_p0, %p1483_p13 }
 0x563   :  { %1491 = shalt.err (!%p1488_p1)
}
 0x564   :  { %999 = dma.vmem_to_hbm [thread:$0]  %s997_s13, 128, %s1877_s8, [#allocation4]  }
 0x565   :  { %1494 = dma.done.wait [#allocation4], 128  }
 0x566   :  { %1495 = vsyncadd [#allocation4], 4294967168 }
 0x567   :  { %1003 = vsyncpa [#allocation3], 1 }
 0x568   :  { %1004 = vsyncpa [#allocation4], 1 }

</bundles_post_ra>
